<compile_context>
chip_gen: v5e
topology: v5e:2x2
jax: 0.10.0
libtpu: 0.0.40
codegen_flags: <defaults>
</compile_context>

<pallas_src>
import jax
import jax.numpy as jnp
from jax.experimental import pallas as pl
from jax.experimental.pallas import tpu as pltpu


def _make_kernel(n_vars, batch_tile, patch_len, stride, num_patches):
    V, Bt, P = n_vars, batch_tile, patch_len
    R = V * Bt                           # rows per patch-slab; batch innermost
    inv_m = 1.0 / (V * num_patches)

    def kernel(x_ref, w1_ref, b1_ref, w2_ref, b2_ref, w3_ref, b3_ref,
               w4_ref, b4_ref, o_ref):
        # ---- in-kernel unfold: overlapping patches via static lane slices ----
        # x_ref: (V*Bt, S) f32, rows ordered (var, batch) with batch innermost.
        pieces = [x_ref[:, n * stride:n * stride + P] for n in range(num_patches)]
        patches = jnp.concatenate(pieces, axis=0).astype(jnp.bfloat16)   # (N*R, P)

        # ---- patch_embedding: Linear(P, D) + ReLU (Dropout = identity) ----
        h = jnp.dot(patches, w1_ref[...], preferred_element_type=jnp.float32)
        h = jnp.maximum(h + b1_ref[...], 0.0)

        # ---- seasonal_processor: 2 x (Linear(D, D) + ReLU) ----
        h = jnp.dot(h.astype(jnp.bfloat16), w2_ref[...],
                    preferred_element_type=jnp.float32)
        h = jnp.maximum(h + b2_ref[...], 0.0)
        h = jnp.dot(h.astype(jnp.bfloat16), w3_ref[...],
                    preferred_element_type=jnp.float32)
        h = jnp.maximum(h + b3_ref[...], 0.0)                            # (N*R, D)

        # ---- per-batch mean over V*num_patches rows (VPU adds, MXU-free) ----
        # Row (n, v, b) sits at (n*V + v)*Bt + b, so every slice below starts at
        # an 8-aligned sublane offset (Bt is a multiple of 8).
        acc = h[0:R, :]
        for n in range(1, num_patches):
            acc = acc + h[n * R:(n + 1) * R, :]                          # (R, D)
        m = acc[0:Bt, :]
        for v in range(1, V):
            m = m + acc[v * Bt:(v + 1) * Bt, :]                          # (Bt, D)
        m = m * inv_m

        # ---- predict: Linear(D, P), lane-padded to a 128-wide output ----
        y = jnp.dot(m.astype(jnp.bfloat16), w4_ref[...],
                    preferred_element_type=jnp.float32)
        o_ref[...] = y + b4_ref[...]

    return kernel


def _choose_tiling(B, M, D, max_batch_tile=None):
    """Pick the per-grid-step batch tile (multiple of 8) from the VMEM capacity
    of the current TPU generation; on v7x also cap it so the "parallel" grid
    has >= 2 steps (one per TensorCore)."""
    try:
        vmem_cap = int(pltpu.get_tpu_info().vmem_capacity_bytes)
    except Exception:
        vmem_cap = 64 << 20                          # conservative: v7x per-core
    try:
        dual_tc = "v7" in jax.devices()[0].device_kind.lower()
    except Exception:
        dual_tc = False

    # rough in-kernel bytes per patch row: f32 h + bf16 copies + padded patch
    bytes_per_row = 12 * D + 1024
    rows_cap = max((vmem_cap // 3) // bytes_per_row, 64)
    base_rows = 2048 if vmem_cap >= (96 << 20) else 1024    # v5e/v6e vs v7x
    target_rows = int(min(base_rows, rows_cap))

    Bt = max(1, min(B, target_rows // max(M, 1)))
    if dual_tc and B >= 16:
        Bt = min(Bt, -(-B // 2))                     # keep G >= 2 on dual-TC chips
    if max_batch_tile is not None:
        Bt = max(1, min(Bt, max_batch_tile))
    Bt = ((Bt + 7) // 8) * 8                         # sublane-aligned batch tile
    # TODO(synk): best-effort bump Bt so Bt*M is a multiple of 256 (v6e/v7x MXU)
    # when it fits the VMEM budget; for huge M also split the patch dim over the
    # grid instead of forcing a minimum of 8 batch elements per step.
    G = -(-B // Bt)
    B_pad = G * Bt
    vmem_limit = int(min(vmem_cap * 3 // 4, 96 << 20))
    return Bt, G, B_pad, vmem_limit


def seasonal_model_forward(x, params, patch_len, stride, max_batch_tile=None):
    """x: (B, S, V) float32 -> (B, patch_len) float32"""
    B, S, V = x.shape
    P = patch_len
    N = (S - P) // stride + 1
    M = V * N
    w1, b1, w2, b2, w3, b3, w4, b4 = params
    D = w1.shape[1]

    Bt, G, B_pad, vmem_limit = _choose_tiling(B, M, D, max_batch_tile)

    # zero-pad the batch to a multiple of Bt (padded rows are sliced off below;
    # the mean is per batch element, so real rows are unaffected)
    x_pad = x
    if B_pad != B:
        x_pad = jnp.concatenate(
            [x_pad, jnp.zeros((B_pad - B, S, V), x_pad.dtype)], axis=0)

    # (B_pad, S, V) -> (G, V*Bt, S): each grid step reads one contiguous slab
    # whose rows are ordered (var, batch) with the batch index innermost.
    x_tiles = jnp.transpose(x_pad.reshape(G, Bt, S, V),
                            (0, 3, 1, 2)).reshape(G, V * Bt, S)

    # weights: bf16 MXU operands, f32 biases; lane-pad the predict head to 128
    Pp = ((P + 127) // 128) * 128
    w1b = w1.astype(jnp.bfloat16)
    w2b = w2.astype(jnp.bfloat16)
    w3b = w3.astype(jnp.bfloat16)
    w4p = jnp.zeros((D, Pp), jnp.bfloat16).at[:, :P].set(w4.astype(jnp.bfloat16))
    b4p = jnp.zeros((1, Pp), jnp.float32).at[:, :P].set(b4)

    kernel = _make_kernel(V, Bt, P, stride, N)

    def _pallas_forward(single_buffer_weights):
        if single_buffer_weights:
            # grid-invariant operands: one VMEM copy instead of two
            wmode = {"pipeline_mode": pl.Buffered(buffer_count=1)}
        else:
            wmode = {}

        def wspec(a):
            return pl.BlockSpec(a.shape, lambda g: (0,) * a.ndim, **wmode)

        return pl.pallas_call(
            kernel,
            out_shape=jax.ShapeDtypeStruct((B_pad, Pp), jnp.float32),
            grid=(G,),
            in_specs=[
                pl.BlockSpec((pl.Squeezed(), V * Bt, S), lambda g: (g, 0, 0)),
                wspec(w1b), wspec(b1), wspec(w2b), wspec(b2),
                wspec(w3b), wspec(b3), wspec(w4p), wspec(b4p),
            ],
            out_specs=pl.BlockSpec((Bt, Pp), lambda g: (g, 0)),
            compiler_params=pltpu.CompilerParams(
                dimension_semantics=("parallel",),
                vmem_limit_bytes=vmem_limit),
        )(x_tiles, w1b, b1, w2b, b2, w3b, b3, w4p, b4p)

    try:
        out = _pallas_forward(True)
    except Exception:
        # this jax/libtpu build rejects single-buffered BlockSpecs; fall back
        out = _pallas_forward(False)

    # strip both paddings: batch padding and the lane padding of the output
    return out[:B, :P]


def init_params(key, patch_len, d_model):
    ks = jax.random.split(key, 8)
    scale = 0.1
    w1 = jax.random.normal(ks[0], (patch_len, d_model), jnp.float32) * scale
    b1 = jax.random.normal(ks[1], (1, d_model), jnp.float32) * scale
    w2 = jax.random.normal(ks[2], (d_model, d_model), jnp.float32) * scale
    b2 = jax.random.normal(ks[3], (1, d_model), jnp.float32) * scale
    w3 = jax.random.normal(ks[4], (d_model, d_model), jnp.float32) * scale
    b3 = jax.random.normal(ks[5], (1, d_model), jnp.float32) * scale
    w4 = jax.random.normal(ks[6], (d_model, patch_len), jnp.float32) * scale
    b4 = jax.random.normal(ks[7], (1, patch_len), jnp.float32) * scale
    return (w1, b1, w2, b2, w3, b3, w4, b4)


def reference_forward(x, params, patch_len, stride):
    """Pure-JAX f32 reference mirroring the PyTorch forward (dropout = identity)."""
    w1, b1, w2, b2, w3, b3, w4, b4 = params
    B, S, V = x.shape
    num_patches = (S - patch_len) // stride + 1
    x_perm = jnp.transpose(x, (0, 2, 1))
    idx = jnp.arange(num_patches)[:, None] * stride + jnp.arange(patch_len)[None, :]
    p = x_perm[:, :, idx].reshape(B * V * num_patches, patch_len)
    h = jnp.maximum(p @ w1 + b1, 0.0)
    h = jnp.maximum(h @ w2 + b2, 0.0)
    h = jnp.maximum(h @ w3 + b3, 0.0)
    h = h.reshape(B, V * num_patches, -1).mean(axis=1)
    return h @ w4 + b4


if __name__ == "__main__":
    key = jax.random.PRNGKey(0)

    # case 1: tiny shapes consistent with the module: x is (batch, seq_len, n_vars)
    B, S, V = 2, 16, 4
    patch_len, stride, d_model = 8, 4, 32
    k_x, k_p, k_x2, k_p2 = jax.random.split(key, 4)
    x = jax.random.normal(k_x, (B, S, V), jnp.float32)
    params = init_params(k_p, patch_len, d_model)

    y = jax.block_until_ready(seasonal_model_forward(x, params, patch_len, stride))
    y_ref = reference_forward(x, params, patch_len, stride)
    assert y.shape == (B, patch_len)
    # bf16 MXU operands -> loosened tolerance vs. the f32 reference (intentional)
    assert jnp.allclose(y, y_ref, atol=2e-2, rtol=2e-2)

    # case 2: exercises a multi-step "parallel" grid plus batch/lane padding
    B2, S2, V2 = 20, 32, 3
    patch_len2, stride2, d_model2 = 16, 8, 64
    x2 = jax.random.normal(k_x2, (B2, S2, V2), jnp.float32)
    params2 = init_params(k_p2, patch_len2, d_model2)

    y2 = jax.block_until_ready(
        seasonal_model_forward(x2, params2, patch_len2, stride2, max_batch_tile=8))
    y2_ref = reference_forward(x2, params2, patch_len2, stride2)
    assert y2.shape == (B2, patch_len2)
    assert jnp.allclose(y2, y2_ref, atol=2e-2, rtol=2e-2)

    print("KERNEL_OK")
</pallas_src>

<mosaic_0001>
module attributes {stable_mosaic.version = 11 : i64} {
  func.func @kernel(%arg0: i32, %arg1: memref<1x32x16xf32, #tpu.memory_space<vmem>>, %arg2: memref<8x32xbf16, #tpu.memory_space<vmem>>, %arg3: memref<1x32xf32, #tpu.memory_space<vmem>>, %arg4: memref<32x32xbf16, #tpu.memory_space<vmem>>, %arg5: memref<1x32xf32, #tpu.memory_space<vmem>>, %arg6: memref<32x32xbf16, #tpu.memory_space<vmem>>, %arg7: memref<1x32xf32, #tpu.memory_space<vmem>>, %arg8: memref<32x128xbf16, #tpu.memory_space<vmem>>, %arg9: memref<1x128xf32, #tpu.memory_space<vmem>>, %arg10: memref<8x128xf32, #tpu.memory_space<vmem>>) attributes {dimension_semantics = [#tpu.dimension_semantics<parallel>], iteration_bounds = array<i64: 1>, scalar_prefetch = 0 : i64, scratch_operands = 0 : i64, tpu.core_type = #tpu.core_type<tc>, window_params = [{transform_indices = @transform_0, window_bounds = array<i64: 1, 32, 16>}, {pipeline_mode = #tpu.pipeline_mode<synchronous>, transform_indices = @transform_1, window_bounds = array<i64: 8, 32>}, {pipeline_mode = #tpu.pipeline_mode<synchronous>, transform_indices = @transform_2, window_bounds = array<i64: 1, 32>}, {pipeline_mode = #tpu.pipeline_mode<synchronous>, transform_indices = @transform_3, window_bounds = array<i64: 32, 32>}, {pipeline_mode = #tpu.pipeline_mode<synchronous>, transform_indices = @transform_4, window_bounds = array<i64: 1, 32>}, {pipeline_mode = #tpu.pipeline_mode<synchronous>, transform_indices = @transform_5, window_bounds = array<i64: 32, 32>}, {pipeline_mode = #tpu.pipeline_mode<synchronous>, transform_indices = @transform_6, window_bounds = array<i64: 1, 32>}, {pipeline_mode = #tpu.pipeline_mode<synchronous>, transform_indices = @transform_7, window_bounds = array<i64: 32, 128>}, {pipeline_mode = #tpu.pipeline_mode<synchronous>, transform_indices = @transform_8, window_bounds = array<i64: 1, 128>}, {transform_indices = @transform_9, window_bounds = array<i64: 8, 128>}]} {
    %c0 = arith.constant 0 : index
    %c0_0 = arith.constant 0 : index
    %c0_1 = arith.constant 0 : index
    %0 = vector.load %arg1[%c0, %c0_0, %c0_1] : memref<1x32x16xf32, #tpu.memory_space<vmem>>, vector<1x32x8xf32>
    %1 = vector.shape_cast %0 : vector<1x32x8xf32> to vector<32x8xf32>
    %c0_2 = arith.constant 0 : index
    %c0_3 = arith.constant 0 : index
    %c4 = arith.constant 4 : index
    %2 = vector.load %arg1[%c0_2, %c0_3, %c4] : memref<1x32x16xf32, #tpu.memory_space<vmem>>, vector<1x32x8xf32>
    %3 = vector.shape_cast %2 : vector<1x32x8xf32> to vector<32x8xf32>
    %c0_4 = arith.constant 0 : index
    %c0_5 = arith.constant 0 : index
    %c8 = arith.constant 8 : index
    %4 = vector.load %arg1[%c0_4, %c0_5, %c8] : memref<1x32x16xf32, #tpu.memory_space<vmem>>, vector<1x32x8xf32>
    %5 = vector.shape_cast %4 : vector<1x32x8xf32> to vector<32x8xf32>
    %6 = tpu.concatenate %1, %3, %5 in 0 : vector<32x8xf32>, vector<32x8xf32>, vector<32x8xf32> -> vector<96x8xf32>
    %7 = arith.truncf %6 : vector<96x8xf32> to vector<96x8xbf16>
    %c0_6 = arith.constant 0 : index
    %c0_7 = arith.constant 0 : index
    %8 = vector.load %arg2[%c0_6, %c0_7] : memref<8x32xbf16, #tpu.memory_space<vmem>>, vector<8x32xbf16>
    %cst = arith.constant dense<0.000000e+00> : vector<96x32xf32>
    %9 = tpu.matmul %7, %8, %cst {dimension_numbers = #tpu.dot_dimension_numbers<[1], [0], [0], [1], [0, 0, 1, 1], [], []>} : vector<96x8xbf16>, vector<8x32xbf16>, vector<96x32xf32> -> vector<96x32xf32>
    %c0_8 = arith.constant 0 : index
    %c0_9 = arith.constant 0 : index
    %10 = vector.load %arg3[%c0_8, %c0_9] : memref<1x32xf32, #tpu.memory_space<vmem>>, vector<1x32xf32>
    %11 = vector.broadcast %10 : vector<1x32xf32> to vector<96x32xf32>
    %12 = arith.addf %9, %11 : vector<96x32xf32>
    %cst_10 = arith.constant 0.000000e+00 : f32
    %13 = vector.broadcast %cst_10 : f32 to vector<96x32xf32>
    %14 = arith.maximumf %12, %13 : vector<96x32xf32>
    %15 = arith.truncf %14 : vector<96x32xf32> to vector<96x32xbf16>
    %c0_11 = arith.constant 0 : index
    %c0_12 = arith.constant 0 : index
    %16 = vector.load %arg4[%c0_11, %c0_12] : memref<32x32xbf16, #tpu.memory_space<vmem>>, vector<32x32xbf16>
    %cst_13 = arith.constant dense<0.000000e+00> : vector<96x32xf32>
    %17 = tpu.matmul %15, %16, %cst_13 {dimension_numbers = #tpu.dot_dimension_numbers<[1], [0], [0], [1], [0, 0, 1, 1], [], []>} : vector<96x32xbf16>, vector<32x32xbf16>, vector<96x32xf32> -> vector<96x32xf32>
    %c0_14 = arith.constant 0 : index
    %c0_15 = arith.constant 0 : index
    %18 = vector.load %arg5[%c0_14, %c0_15] : memref<1x32xf32, #tpu.memory_space<vmem>>, vector<1x32xf32>
    %19 = vector.broadcast %18 : vector<1x32xf32> to vector<96x32xf32>
    %20 = arith.addf %17, %19 : vector<96x32xf32>
    %cst_16 = arith.constant 0.000000e+00 : f32
    %21 = vector.broadcast %cst_16 : f32 to vector<96x32xf32>
    %22 = arith.maximumf %20, %21 : vector<96x32xf32>
    %23 = arith.truncf %22 : vector<96x32xf32> to vector<96x32xbf16>
    %c0_17 = arith.constant 0 : index
    %c0_18 = arith.constant 0 : index
    %24 = vector.load %arg6[%c0_17, %c0_18] : memref<32x32xbf16, #tpu.memory_space<vmem>>, vector<32x32xbf16>
    %cst_19 = arith.constant dense<0.000000e+00> : vector<96x32xf32>
    %25 = tpu.matmul %23, %24, %cst_19 {dimension_numbers = #tpu.dot_dimension_numbers<[1], [0], [0], [1], [0, 0, 1, 1], [], []>} : vector<96x32xbf16>, vector<32x32xbf16>, vector<96x32xf32> -> vector<96x32xf32>
    %c0_20 = arith.constant 0 : index
    %c0_21 = arith.constant 0 : index
    %26 = vector.load %arg7[%c0_20, %c0_21] : memref<1x32xf32, #tpu.memory_space<vmem>>, vector<1x32xf32>
    %27 = vector.broadcast %26 : vector<1x32xf32> to vector<96x32xf32>
    %28 = arith.addf %25, %27 : vector<96x32xf32>
    %cst_22 = arith.constant 0.000000e+00 : f32
    %29 = vector.broadcast %cst_22 : f32 to vector<96x32xf32>
    %30 = arith.maximumf %28, %29 : vector<96x32xf32>
    %31 = vector.extract_strided_slice %30 {offsets = [0, 0], sizes = [32, 32], strides = [1, 1]} : vector<96x32xf32> to vector<32x32xf32>
    %32 = vector.extract_strided_slice %30 {offsets = [32, 0], sizes = [32, 32], strides = [1, 1]} : vector<96x32xf32> to vector<32x32xf32>
    %33 = arith.addf %31, %32 : vector<32x32xf32>
    %34 = vector.extract_strided_slice %30 {offsets = [64, 0], sizes = [32, 32], strides = [1, 1]} : vector<96x32xf32> to vector<32x32xf32>
    %35 = arith.addf %33, %34 : vector<32x32xf32>
    %36 = vector.extract_strided_slice %35 {offsets = [0, 0], sizes = [8, 32], strides = [1, 1]} : vector<32x32xf32> to vector<8x32xf32>
    %37 = vector.extract_strided_slice %35 {offsets = [8, 0], sizes = [8, 32], strides = [1, 1]} : vector<32x32xf32> to vector<8x32xf32>
    %38 = arith.addf %36, %37 : vector<8x32xf32>
    %39 = vector.extract_strided_slice %35 {offsets = [16, 0], sizes = [8, 32], strides = [1, 1]} : vector<32x32xf32> to vector<8x32xf32>
    %40 = arith.addf %38, %39 : vector<8x32xf32>
    %41 = vector.extract_strided_slice %35 {offsets = [24, 0], sizes = [8, 32], strides = [1, 1]} : vector<32x32xf32> to vector<8x32xf32>
    %42 = arith.addf %40, %41 : vector<8x32xf32>
    %cst_23 = arith.constant 0.0833333358 : f32
    %43 = vector.broadcast %cst_23 : f32 to vector<8x32xf32>
    %44 = arith.mulf %42, %43 : vector<8x32xf32>
    %45 = arith.truncf %44 : vector<8x32xf32> to vector<8x32xbf16>
    %c0_24 = arith.constant 0 : index
    %c0_25 = arith.constant 0 : index
    %46 = vector.load %arg8[%c0_24, %c0_25] : memref<32x128xbf16, #tpu.memory_space<vmem>>, vector<32x128xbf16>
    %cst_26 = arith.constant dense<0.000000e+00> : vector<8x128xf32>
    %47 = tpu.matmul %45, %46, %cst_26 {dimension_numbers = #tpu.dot_dimension_numbers<[1], [0], [0], [1], [0, 0, 1, 1], [], []>} : vector<8x32xbf16>, vector<32x128xbf16>, vector<8x128xf32> -> vector<8x128xf32>
    %c0_27 = arith.constant 0 : index
    %c0_28 = arith.constant 0 : index
    %48 = vector.load %arg9[%c0_27, %c0_28] : memref<1x128xf32, #tpu.memory_space<vmem>>, vector<1x128xf32>
    %49 = vector.broadcast %48 : vector<1x128xf32> to vector<8x128xf32>
    %50 = arith.addf %47, %49 : vector<8x128xf32>
    %c0_29 = arith.constant 0 : index
    %c0_30 = arith.constant 0 : index
    %51 = vector.load %arg10[%c0_29, %c0_30] : memref<8x128xf32, #tpu.memory_space<vmem>>, vector<8x128xf32>
    tpu.vector_store %arg10[%c0_29, %c0_30], %50 {strides = array<i32>} : memref<8x128xf32, #tpu.memory_space<vmem>>, vector<8x128xf32>,
    return
  }
  func.func @transform_0(%arg0: i32) -> (i32, i32, i32) {
    %c0_i32 = arith.constant 0 : i32
    %c0_i32_0 = arith.constant 0 : i32
    %c0_i32_1 = arith.constant 0 : i32
    return %arg0, %c0_i32, %c0_i32_0 : i32, i32, i32
  }
  func.func @transform_1(%arg0: i32) -> (i32, i32) {
    %c0_i32 = arith.constant 0 : i32
    %c0_i32_0 = arith.constant 0 : i32
    %c0_i32_1 = arith.constant 0 : i32
    return %c0_i32, %c0_i32_0 : i32, i32
  }
  func.func @transform_2(%arg0: i32) -> (i32, i32) {
    %c0_i32 = arith.constant 0 : i32
    %c0_i32_0 = arith.constant 0 : i32
    %c0_i32_1 = arith.constant 0 : i32
    return %c0_i32, %c0_i32_0 : i32, i32
  }
  func.func @transform_3(%arg0: i32) -> (i32, i32) {
    %c0_i32 = arith.constant 0 : i32
    %c0_i32_0 = arith.constant 0 : i32
    %c0_i32_1 = arith.constant 0 : i32
    return %c0_i32, %c0_i32_0 : i32, i32
  }
  func.func @transform_4(%arg0: i32) -> (i32, i32) {
    %c0_i32 = arith.constant 0 : i32
    %c0_i32_0 = arith.constant 0 : i32
    %c0_i32_1 = arith.constant 0 : i32
    return %c0_i32, %c0_i32_0 : i32, i32
  }
  func.func @transform_5(%arg0: i32) -> (i32, i32) {
    %c0_i32 = arith.constant 0 : i32
    %c0_i32_0 = arith.constant 0 : i32
    %c0_i32_1 = arith.constant 0 : i32
    return %c0_i32, %c0_i32_0 : i32, i32
  }
  func.func @transform_6(%arg0: i32) -> (i32, i32) {
    %c0_i32 = arith.constant 0 : i32
    %c0_i32_0 = arith.constant 0 : i32
    %c0_i32_1 = arith.constant 0 : i32
    return %c0_i32, %c0_i32_0 : i32, i32
  }
  func.func @transform_7(%arg0: i32) -> (i32, i32) {
    %c0_i32 = arith.constant 0 : i32
    %c0_i32_0 = arith.constant 0 : i32
    %c0_i32_1 = arith.constant 0 : i32
    return %c0_i32, %c0_i32_0 : i32, i32
  }
  func.func @transform_8(%arg0: i32) -> (i32, i32) {
    %c0_i32 = arith.constant 0 : i32
    %c0_i32_0 = arith.constant 0 : i32
    %c0_i32_1 = arith.constant 0 : i32
    return %c0_i32, %c0_i32_0 : i32, i32
  }
  func.func @transform_9(%arg0: i32) -> (i32, i32) {
    %c0_i32 = arith.constant 0 : i32
    %c0_i32_0 = arith.constant 0 : i32
    return %arg0, %c0_i32 : i32, i32
  }
}

module attributes {stable_mosaic.version = 11 : i64} {
  func.func @kernel(%arg0: i32, %arg1: memref<1x32x16xf32, #tpu.memory_space<vmem>>, %arg2: memref<8x32xbf16, #tpu.memory_space<vmem>>, %arg3: memref<1x32xf32, #tpu.memory_space<vmem>>, %arg4: memref<32x32xbf16, #tpu.memory_space<vmem>>, %arg5: memref<1x32xf32, #tpu.memory_space<vmem>>, %arg6: memref<32x32xbf16, #tpu.memory_space<vmem>>, %arg7: memref<1x32xf32, #tpu.memory_space<vmem>>, %arg8: memref<32x128xbf16, #tpu.memory_space<vmem>>, %arg9: memref<1x128xf32, #tpu.memory_space<vmem>>, %arg10: memref<8x128xf32, #tpu.memory_space<vmem>>) attributes {dimension_semantics = [#tpu.dimension_semantics<parallel>], iteration_bounds = array<i64: 1>, scalar_prefetch = 0 : i64, scratch_operands = 0 : i64, tpu.core_type = #tpu.core_type<tc>, window_params = [{transform_indices = @transform_0, window_bounds = array<i64: 1, 32, 16>}, {pipeline_mode = #tpu.pipeline_mode<synchronous>, transform_indices = @transform_1, window_bounds = array<i64: 8, 32>}, {pipeline_mode = #tpu.pipeline_mode<synchronous>, transform_indices = @transform_2, window_bounds = array<i64: 1, 32>}, {pipeline_mode = #tpu.pipeline_mode<synchronous>, transform_indices = @transform_3, window_bounds = array<i64: 32, 32>}, {pipeline_mode = #tpu.pipeline_mode<synchronous>, transform_indices = @transform_4, window_bounds = array<i64: 1, 32>}, {pipeline_mode = #tpu.pipeline_mode<synchronous>, transform_indices = @transform_5, window_bounds = array<i64: 32, 32>}, {pipeline_mode = #tpu.pipeline_mode<synchronous>, transform_indices = @transform_6, window_bounds = array<i64: 1, 32>}, {pipeline_mode = #tpu.pipeline_mode<synchronous>, transform_indices = @transform_7, window_bounds = array<i64: 32, 128>}, {pipeline_mode = #tpu.pipeline_mode<synchronous>, transform_indices = @transform_8, window_bounds = array<i64: 1, 128>}, {transform_indices = @transform_9, window_bounds = array<i64: 8, 128>}]} {
    %c0 = arith.constant 0 : index
    %c0_0 = arith.constant 0 : index
    %c0_1 = arith.constant 0 : index
    %0 = vector.load %arg1[%c0, %c0_0, %c0_1] : memref<1x32x16xf32, #tpu.memory_space<vmem>>, vector<1x32x8xf32>
    %1 = vector.shape_cast %0 : vector<1x32x8xf32> to vector<32x8xf32>
    %c0_2 = arith.constant 0 : index
    %c0_3 = arith.constant 0 : index
    %c4 = arith.constant 4 : index
    %2 = vector.load %arg1[%c0_2, %c0_3, %c4] : memref<1x32x16xf32, #tpu.memory_space<vmem>>, vector<1x32x8xf32>
    %3 = vector.shape_cast %2 : vector<1x32x8xf32> to vector<32x8xf32>
    %c0_4 = arith.constant 0 : index
    %c0_5 = arith.constant 0 : index
    %c8 = arith.constant 8 : index
    %4 = vector.load %arg1[%c0_4, %c0_5, %c8] : memref<1x32x16xf32, #tpu.memory_space<vmem>>, vector<1x32x8xf32>
    %5 = vector.shape_cast %4 : vector<1x32x8xf32> to vector<32x8xf32>
    %6 = tpu.concatenate %1, %3, %5 in 0 : vector<32x8xf32>, vector<32x8xf32>, vector<32x8xf32> -> vector<96x8xf32>
    %7 = arith.truncf %6 : vector<96x8xf32> to vector<96x8xbf16>
    %c0_6 = arith.constant 0 : index
    %c0_7 = arith.constant 0 : index
    %8 = vector.load %arg2[%c0_6, %c0_7] : memref<8x32xbf16, #tpu.memory_space<vmem>>, vector<8x32xbf16>
    %cst = arith.constant dense<0.000000e+00> : vector<96x32xf32>
    %9 = tpu.matmul %7, %8, %cst {dimension_numbers = #tpu.dot_dimension_numbers<[1], [0], [0], [1], [0, 0, 1, 1], [], []>} : vector<96x8xbf16>, vector<8x32xbf16>, vector<96x32xf32> -> vector<96x32xf32>
    %c0_8 = arith.constant 0 : index
    %c0_9 = arith.constant 0 : index
    %10 = vector.load %arg3[%c0_8, %c0_9] : memref<1x32xf32, #tpu.memory_space<vmem>>, vector<1x32xf32>
    %11 = vector.broadcast %10 : vector<1x32xf32> to vector<96x32xf32>
    %12 = arith.addf %9, %11 : vector<96x32xf32>
    %cst_10 = arith.constant 0.000000e+00 : f32
    %13 = vector.broadcast %cst_10 : f32 to vector<96x32xf32>
    %14 = arith.maximumf %12, %13 : vector<96x32xf32>
    %15 = arith.truncf %14 : vector<96x32xf32> to vector<96x32xbf16>
    %c0_11 = arith.constant 0 : index
    %c0_12 = arith.constant 0 : index
    %16 = vector.load %arg4[%c0_11, %c0_12] : memref<32x32xbf16, #tpu.memory_space<vmem>>, vector<32x32xbf16>
    %cst_13 = arith.constant dense<0.000000e+00> : vector<96x32xf32>
    %17 = tpu.matmul %15, %16, %cst_13 {dimension_numbers = #tpu.dot_dimension_numbers<[1], [0], [0], [1], [0, 0, 1, 1], [], []>} : vector<96x32xbf16>, vector<32x32xbf16>, vector<96x32xf32> -> vector<96x32xf32>
    %c0_14 = arith.constant 0 : index
    %c0_15 = arith.constant 0 : index
    %18 = vector.load %arg5[%c0_14, %c0_15] : memref<1x32xf32, #tpu.memory_space<vmem>>, vector<1x32xf32>
    %19 = vector.broadcast %18 : vector<1x32xf32> to vector<96x32xf32>
    %20 = arith.addf %17, %19 : vector<96x32xf32>
    %cst_16 = arith.constant 0.000000e+00 : f32
    %21 = vector.broadcast %cst_16 : f32 to vector<96x32xf32>
    %22 = arith.maximumf %20, %21 : vector<96x32xf32>
    %23 = arith.truncf %22 : vector<96x32xf32> to vector<96x32xbf16>
    %c0_17 = arith.constant 0 : index
    %c0_18 = arith.constant 0 : index
    %24 = vector.load %arg6[%c0_17, %c0_18] : memref<32x32xbf16, #tpu.memory_space<vmem>>, vector<32x32xbf16>
    %cst_19 = arith.constant dense<0.000000e+00> : vector<96x32xf32>
    %25 = tpu.matmul %23, %24, %cst_19 {dimension_numbers = #tpu.dot_dimension_numbers<[1], [0], [0], [1], [0, 0, 1, 1], [], []>} : vector<96x32xbf16>, vector<32x32xbf16>, vector<96x32xf32> -> vector<96x32xf32>
    %c0_20 = arith.constant 0 : index
    %c0_21 = arith.constant 0 : index
    %26 = vector.load %arg7[%c0_20, %c0_21] : memref<1x32xf32, #tpu.memory_space<vmem>>, vector<1x32xf32>
    %27 = vector.broadcast %26 : vector<1x32xf32> to vector<96x32xf32>
    %28 = arith.addf %25, %27 : vector<96x32xf32>
    %cst_22 = arith.constant 0.000000e+00 : f32
    %29 = vector.broadcast %cst_22 : f32 to vector<96x32xf32>
    %30 = arith.maximumf %28, %29 : vector<96x32xf32>
    %31 = vector.extract_strided_slice %30 {offsets = [0, 0], sizes = [32, 32], strides = [1, 1]} : vector<96x32xf32> to vector<32x32xf32>
    %32 = vector.extract_strided_slice %30 {offsets = [32, 0], sizes = [32, 32], strides = [1, 1]} : vector<96x32xf32> to vector<32x32xf32>
    %33 = arith.addf %31, %32 : vector<32x32xf32>
    %34 = vector.extract_strided_slice %30 {offsets = [64, 0], sizes = [32, 32], strides = [1, 1]} : vector<96x32xf32> to vector<32x32xf32>
    %35 = arith.addf %33, %34 : vector<32x32xf32>
    %36 = vector.extract_strided_slice %35 {offsets = [0, 0], sizes = [8, 32], strides = [1, 1]} : vector<32x32xf32> to vector<8x32xf32>
    %37 = vector.extract_strided_slice %35 {offsets = [8, 0], sizes = [8, 32], strides = [1, 1]} : vector<32x32xf32> to vector<8x32xf32>
    %38 = arith.addf %36, %37 : vector<8x32xf32>
    %39 = vector.extract_strided_slice %35 {offsets = [16, 0], sizes = [8, 32], strides = [1, 1]} : vector<32x32xf32> to vector<8x32xf32>
    %40 = arith.addf %38, %39 : vector<8x32xf32>
    %41 = vector.extract_strided_slice %35 {offsets = [24, 0], sizes = [8, 32], strides = [1, 1]} : vector<32x32xf32> to vector<8x32xf32>
    %42 = arith.addf %40, %41 : vector<8x32xf32>
    %cst_23 = arith.constant 0.0833333358 : f32
    %43 = vector.broadcast %cst_23 : f32 to vector<8x32xf32>
    %44 = arith.mulf %42, %43 : vector<8x32xf32>
    %45 = arith.truncf %44 : vector<8x32xf32> to vector<8x32xbf16>
    %c0_24 = arith.constant 0 : index
    %c0_25 = arith.constant 0 : index
    %46 = vector.load %arg8[%c0_24, %c0_25] : memref<32x128xbf16, #tpu.memory_space<vmem>>, vector<32x128xbf16>
    %cst_26 = arith.constant dense<0.000000e+00> : vector<8x128xf32>
    %47 = tpu.matmul %45, %46, %cst_26 {dimension_numbers = #tpu.dot_dimension_numbers<[1], [0], [0], [1], [0, 0, 1, 1], [], []>} : vector<8x32xbf16>, vector<32x128xbf16>, vector<8x128xf32> -> vector<8x128xf32>
    %c0_27 = arith.constant 0 : index
    %c0_28 = arith.constant 0 : index
    %48 = vector.load %arg9[%c0_27, %c0_28] : memref<1x128xf32, #tpu.memory_space<vmem>>, vector<1x128xf32>
    %49 = vector.broadcast %48 : vector<1x128xf32> to vector<8x128xf32>
    %50 = arith.addf %47, %49 : vector<8x128xf32>
    %c0_29 = arith.constant 0 : index
    %c0_30 = arith.constant 0 : index
    %51 = vector.load %arg10[%c0_29, %c0_30] : memref<8x128xf32, #tpu.memory_space<vmem>>, vector<8x128xf32>
    tpu.vector_store %arg10[%c0_29, %c0_30], %50 {strides = array<i32>} : memref<8x128xf32, #tpu.memory_space<vmem>>, vector<8x128xf32>,
    return
  }
  func.func @transform_0(%arg0: i32) -> (i32, i32, i32) {
    %c0_i32 = arith.constant 0 : i32
    %c0_i32_0 = arith.constant 0 : i32
    %c0_i32_1 = arith.constant 0 : i32
    return %arg0, %c0_i32, %c0_i32_0 : i32, i32, i32
  }
  func.func @transform_1(%arg0: i32) -> (i32, i32) {
    %c0_i32 = arith.constant 0 : i32
    %c0_i32_0 = arith.constant 0 : i32
    %c0_i32_1 = arith.constant 0 : i32
    return %c0_i32, %c0_i32_0 : i32, i32
  }
  func.func @transform_2(%arg0: i32) -> (i32, i32) {
    %c0_i32 = arith.constant 0 : i32
    %c0_i32_0 = arith.constant 0 : i32
    %c0_i32_1 = arith.constant 0 : i32
    return %c0_i32, %c0_i32_0 : i32, i32
  }
  func.func @transform_3(%arg0: i32) -> (i32, i32) {
    %c0_i32 = arith.constant 0 : i32
    %c0_i32_0 = arith.constant 0 : i32
    %c0_i32_1 = arith.constant 0 : i32
    return %c0_i32, %c0_i32_0 : i32, i32
  }
  func.func @transform_4(%arg0: i32) -> (i32, i32) {
    %c0_i32 = arith.constant 0 : i32
    %c0_i32_0 = arith.constant 0 : i32
    %c0_i32_1 = arith.constant 0 : i32
    return %c0_i32, %c0_i32_0 : i32, i32
  }
  func.func @transform_5(%arg0: i32) -> (i32, i32) {
    %c0_i32 = arith.constant 0 : i32
    %c0_i32_0 = arith.constant 0 : i32
    %c0_i32_1 = arith.constant 0 : i32
    return %c0_i32, %c0_i32_0 : i32, i32
  }
  func.func @transform_6(%arg0: i32) -> (i32, i32) {
    %c0_i32 = arith.constant 0 : i32
    %c0_i32_0 = arith.constant 0 : i32
    %c0_i32_1 = arith.constant 0 : i32
    return %c0_i32, %c0_i32_0 : i32, i32
  }
  func.func @transform_7(%arg0: i32) -> (i32, i32) {
    %c0_i32 = arith.constant 0 : i32
    %c0_i32_0 = arith.constant 0 : i32
    %c0_i32_1 = arith.constant 0 : i32
    return %c0_i32, %c0_i32_0 : i32, i32
  }
  func.func @transform_8(%arg0: i32) -> (i32, i32) {
    %c0_i32 = arith.constant 0 : i32
    %c0_i32_0 = arith.constant 0 : i32
    %c0_i32_1 = arith.constant 0 : i32
    return %c0_i32, %c0_i32_0 : i32, i32
  }
  func.func @transform_9(%arg0: i32) -> (i32, i32) {
    %c0_i32 = arith.constant 0 : i32
    %c0_i32_0 = arith.constant 0 : i32
    return %arg0, %c0_i32 : i32, i32
  }
}

</mosaic_0001>

<bundles_post_ra>
// kernel: tpu_custom_call.1
= control target key start
LH: loop header
LB: loop body
LE: loop exit
PB: predicated region body
PF: predicated region fallthrough
CT: control target
= control target key end

     0   :  { %14 = vsyncpa [#allocation3], 0  ;;  %s692_s0 = inlined_call_operand.vmem [shape: f32[1,32,16], index: 0, kind: input, shape index: {}]   ;;  %s693_s1 = inlined_call_operand.hbm [shape: bf16[8,32], index: 1, kind: input, shape index: {}]   ;;  %s694_s2 = inlined_call_operand.vmem [shape: f32[1,32], index: 2, kind: input, shape index: {}]   ;;  %s695_s3 = inlined_call_operand.vmem [shape: bf16[32,32], index: 3, kind: input, shape index: {}]   ;;  %s696_s4 = inlined_call_operand.vmem [shape: f32[1,32], index: 4, kind: input, shape index: {}]   ;;  %s697_s5 = inlined_call_operand.vmem [shape: bf16[32,32], index: 5, kind: input, shape index: {}]   ;;  %s698_s6 = inlined_call_operand.vmem [shape: f32[1,32], index: 6, kind: input, shape index: {}]   ;;  %s699_s7 = inlined_call_operand.vmem [shape: bf16[32,128], index: 7, kind: input, shape index: {}]   ;;  %s700_s8 = inlined_call_operand.vmem [shape: f32[1,128], index: 8, kind: input, shape index: {}]   ;;  %s701_s9 = inlined_call_operand.hbm [shape: f32[8,128], index: 9, kind: output, shape index: {}]  }
   0x1   :  { %15 = vsyncpa [#allocation4], 0  ;;  %s23_s11 = sshll.u32 %s693_s1, 4  ;;  %s557_s12 = smov [#allocation2]   ;;  %s24_s11 = int_to_ptr.hbm [resolvable:$true] %s23_s11 }
   0x2   :  { %s25_s13 = sshll.u32 %s557_s12, 4  ;;  %s26_s13 = int_to_ptr.vmem [resolvable:$true] %s25_s13 }
   0x3   :  { %28 = dma.hbm_to_vmem [thread:$0]  %s24_s11, 64, %s26_s13, [#allocation3]  }
   0x4   :  { %553 = dma.done.wait [#allocation3], 64  }
   0x5   :  { %554 = vsyncadd [#allocation3], 4294967232  ;;  %vm110_vm0 = vcmask 1043456   ;;  %v50_v0 = vld [vmem:[%s692_s0 + $0x10] sm:$0xff]  ;;  %v51_v1 = vld [vmem:[%s692_s0 + $0x18] sm:$0xff]  ;;  %s558_s21 = smov 120  }
   0x6   :  { %v48_v2 = vld [vmem:[%s692_s0] sm:$0xff]  ;;  %v491_v3 = vpack.i.bf16 %v51_v1, %v50_v0  ;;  %v49_v4 = vld [vmem:[%s692_s0 + $0x8] sm:$0xff]  ;;  %vm91_vm1 = vcmask 64512   ;;  %s559_s22 = smov 124   ;;  %v81_v9 = vpack.c.bf16 %v51_v1, %v50_v0  ;;  %vm191_vm2 = vcmask 261120   ;;  %s560_s15 = smov [#allocation5]  }
   0x7   :  { %v86_v5 = vld [vmem:[#allocation2] sm:$0xf]  ;;  %v481_v6 = vpack.i.bf16 %v49_v4, %v48_v2  ;;  %v80_v8 = vpack.c.bf16 %v49_v4, %v48_v2  ;;  %v467_v18 = vld [vmem:[%s695_s3 + $0x8] sm:$0xff]  ;;  %s411_s16 = sshll.u32 %s560_s15, 4  ;;  %s413_s19 = sshll.u32 %s701_s9, 4  ;;  %s412_s16 = int_to_ptr.vmem [resolvable:$true] %s411_s16  ;;  %s414_s19 = int_to_ptr.hbm [resolvable:$true] %s413_s19 }
   0x8   :  { %v112_v7 = vsel %vm110_vm0, %v86_v5, 0  ;;  %492 = vrot.lane.b32.xlu1 %v491_v3, %s558_s21  ;;  %216 = vmatpush.bf16.msra.mxu1 %v467_v18  ;;  %v466_v19 = vld [vmem:[%s695_s3] sm:$0xff]  ;;  %v469_v55 = vld [vmem:[%s697_s5 + $0x8] sm:$0xff] }
   0x9   :  { %121 = vmatpush.bf16.msra.mxu0 %v112_v7  ;;  %482 = vrot.lane.b32.xlu0 %v481_v6, %s559_s22  ;;  %v639_v24 = vld [vmem:[%s694_s2] ss:$0 sm:$0xff] }
   0xa   :  { %472 = vmatpush.bf16.msra.mxu3 %v112_v7  ;;  %311 = vmatpush.bf16.msra.mxu2 %v469_v55  ;;  %v468_v58 = vld [vmem:[%s697_s5] sm:$0xff] }
   0xb   :  { %v502_v63 = vld [vmem:[%s696_s4] ss:$0 sm:$0xff] }
   0xc   :  { %423 = vmatmul.msk.bf16.vlgmr.msra.gmra.mxu0 %vm91_vm1, %v80_v8  ;;  %217 = vmatpush.bf16.msra.mxu1 %v466_v19 }
   0xe   :  { %473 = vmatpush.bf16.msrb.mxu3 %v467_v18  ;;  %312 = vmatpush.bf16.msra.mxu2 %v468_v58 }
  0x10   :  { %497 = vrot.lane.b32.xlu1 %v481_v6, %s558_s21 }
  0x11   :  { %487 = vrot.lane.b32.xlu0 %v491_v3, %s559_s22 }
  0x12   :  { %474 = vmatpush.bf16.msrb.mxu3 %v466_v19 }
  0x1c   :  { %424 = vmatmul.msk.bf16.gmra.mxu0 %vm91_vm1, %v81_v9 }
  0x7a   :  { %v493_v10 = vpop.permute.xlu1 %492 }
  0x7b   :  { %v495_v11 = vunpack.i.h.bf16 %v493_v10  ;;  %v494_v12 = vunpack.i.l.bf16 %v493_v10  ;;  %v483_v13 = vpop.permute.xlu0 %482 }
  0x7c   :  { %v485_v14 = vunpack.i.h.bf16 %v483_v13  ;;  %v484_v15 = vunpack.i.l.bf16 %v483_v13 }
  0x7d   :  { %v85_v16 = vpack.c.bf16 %v495_v11, %v494_v12 }
  0x7e   :  { %v82_v17 = vpack.c.bf16 %v485_v14, %v484_v15 }
  0x7f   :  { %428 = vmatmul.msk.bf16.vlgmr.msra.gmra.mxu3 %vm91_vm1, %v85_v16 }
  0x80   :  { %425 = vmatmul.msk.bf16.gmra.mxu0 %vm91_vm1, %v82_v17  ;;  %475 = vmatpush.bf16.msra.mxu3 %v469_v55 }
  0x82   :  { %v498_v31 = vpop.permute.xlu1 %497 }
  0x83   :  { %v488_v20 = vpop.permute.xlu0 %487  ;;  %v500_v33 = vunpack.i.h.bf16 %v498_v31  ;;  %v499_v34 = vunpack.i.l.bf16 %v498_v31 }
  0x84   :  { %v490_v21 = vunpack.i.h.bf16 %v488_v20  ;;  %v489_v22 = vunpack.i.l.bf16 %v488_v20  ;;  %476 = vmatpush.bf16.msra.mxu3 %v468_v58 }
  0x85   :  { %v84_v36 = vpack.c.bf16 %v500_v33, %v499_v34 }
  0x86   :  { %v83_v25 = vpack.c.bf16 %v490_v21, %v489_v22 }
  0x89   :  { %v123_v23 = vpop.f32.mrf.mxu0 }
  0x8a   :  { %v124_v26 = vadd.f32 %v639_v24, %v123_v23 }
  0x8c   :  { %v153_v28 = vmax.f32 %v124_v26, 0.0 }
  0x90   :  { %426 = vmatmul.msk.bf16.gmra.mxu0 %vm91_vm1, %v83_v25 }
  0x91   :  { %v125_v27 = vpop.f32.mrf.mxu0 }
  0x92   :  { %v126_v29 = vadd.f32 %v639_v24, %v125_v27 }
  0x94   :  { %v154_v30 = vmax.f32 %v126_v29, 0.0 }
  0x96   :  { %v165_v32 = vpack.c.bf16 %v154_v30, %v153_v28 }
  0x98   :  { %437 = vmatmul.msk.bf16.vlgmr.msra.gmra.mxu1 %vm191_vm2, %v165_v32 }
  0x99   :  { %v128_v35 = vpop.f32.mrf.mxu0 }
  0x9a   :  { %v129_v37 = vadd.f32 %v639_v24, %v128_v35 }
  0x9c   :  { %v155_v39 = vmax.f32 %v129_v37, 0.0 }
  0xa0   :  { %427 = vmatmul.msk.bf16.gmra.mxu0 %vm91_vm1, %v84_v36 }
  0xa1   :  { %v130_v38 = vpop.f32.mrf.mxu0 }
  0xa2   :  { %v131_v40 = vadd.f32 %v639_v24, %v130_v38 }
  0xa4   :  { %v156_v41 = vmax.f32 %v131_v40, 0.0 }
  0xa6   :  { %v166_v42 = vpack.c.bf16 %v156_v41, %v155_v39 }
  0xa8   :  { %438 = vmatmul.msk.bf16.gmra.mxu1 %vm191_vm2, %v166_v42 }
  0xfd   :  { %v133_v43 = vpop.f32.mrf.mxu0 }
  0xfe   :  { %v134_v45 = vadd.f32 %v639_v24, %v133_v43 }
 0x100   :  { %v157_v49 = vmax.f32 %v134_v45, 0.0 }
 0x102   :  { %v148_v44 = vpop.f32.mrf.mxu3 }
 0x103   :  { %v149_v48 = vadd.f32 %v639_v24, %v148_v44 }
 0x105   :  { %v135_v46 = vpop.f32.mrf.mxu0  ;;  %v163_v53 = vmax.f32 %v149_v48, 0.0 }
 0x106   :  { %v136_v47 = vadd.f32 %v639_v24, %v135_v46 }
 0x108   :  { %v158_v50 = vmax.f32 %v136_v47, 0.0 }
 0x10a   :  { %v167_v51 = vpack.c.bf16 %v158_v50, %v157_v49  ;;  %v150_v52 = vpop.f32.mrf.mxu3 }
 0x10b   :  { %v151_v54 = vadd.f32 %v639_v24, %v150_v52 }
 0x10c   :  { %439 = vmatmul.msk.bf16.gmra.mxu1 %vm191_vm2, %v167_v51 }
 0x10d   :  { %v164_v56 = vmax.f32 %v151_v54, 0.0  ;;  %v138_v57 = vpop.f32.mrf.mxu0 }
 0x10e   :  { %v139_v60 = vadd.f32 %v639_v24, %v138_v57 }
 0x10f   :  { %v170_v59 = vpack.c.bf16 %v164_v56, %v163_v53 }
 0x110   :  { %v159_v1 = vmax.f32 %v139_v60, 0.0  ;;  %v470_v60 = vld [vmem:[%s699_s7] sm:$0xff] }
 0x111   :  { %442 = vmatmul.msk.bf16.vlgmr.msrb.gmra.mxu3 %vm191_vm2, %v170_v59  ;;  %v471_v59 = vld [vmem:[%s699_s7 + $0x8] sm:$0xff] }
 0x112   :  { %398 = vmatpush.bf16.msrb.mxu3 %v471_v59 }
 0x115   :  { %v219_v61 = vpop.f32.mrf.mxu1  ;;  %v140_v62 = vpop.f32.mrf.mxu0 }
 0x116   :  { %v141_v0 = vadd.f32 %v639_v24, %v140_v62  ;;  %v220_v3 = vadd.f32 %v502_v63, %v219_v61  ;;  %399 = vmatpush.bf16.msrb.mxu3 %v470_v60 }
 0x118   :  { %v160_v2 = vmax.f32 %v141_v0, 0.0  ;;  %v249_v7 = vmax.f32 %v220_v3, 0.0 }
 0x11a   :  { %v168_v4 = vpack.c.bf16 %v160_v2, %v159_v1 }
 0x11c   :  { %440 = vmatmul.msk.bf16.gmra.mxu1 %vm191_vm2, %v168_v4 }
 0x11d   :  { %v221_v5 = vpop.f32.mrf.mxu1  ;;  %v143_v6 = vpop.f32.mrf.mxu0 }
 0x11e   :  { %v222_v8 = vadd.f32 %v502_v63, %v221_v5  ;;  %v144_v11 = vadd.f32 %v639_v24, %v143_v6 }
 0x120   :  { %v250_v9 = vmax.f32 %v222_v8, 0.0  ;;  %v161_v15 = vmax.f32 %v144_v11, 0.0 }
 0x122   :  { %v261_v10 = vpack.c.bf16 %v250_v9, %v249_v7 }
 0x124   :  { %451 = vmatmul.msk.bf16.vlgmr.msra.gmra.mxu2 %vm191_vm2, %v261_v10 }
 0x125   :  { %v224_v12 = vpop.f32.mrf.mxu1  ;;  %v145_v13 = vpop.f32.mrf.mxu0 }
 0x126   :  { %v146_v14 = vadd.f32 %v639_v24, %v145_v13  ;;  %v225_v17 = vadd.f32 %v502_v63, %v224_v12 }
 0x128   :  { %v162_v16 = vmax.f32 %v146_v14, 0.0  ;;  %v251_v20 = vmax.f32 %v225_v17, 0.0 }
 0x12a   :  { %v169_v18 = vpack.c.bf16 %v162_v16, %v161_v15 }
 0x12c   :  { %441 = vmatmul.msk.bf16.gmra.mxu1 %vm191_vm2, %v169_v18 }
 0x12d   :  { %v226_v19 = vpop.f32.mrf.mxu1 }
 0x12e   :  { %v227_v21 = vadd.f32 %v502_v63, %v226_v19 }
 0x130   :  { %v252_v22 = vmax.f32 %v227_v21, 0.0 }
 0x132   :  { %v262_v23 = vpack.c.bf16 %v252_v22, %v251_v20 }
 0x134   :  { %452 = vmatmul.msk.bf16.gmra.mxu2 %vm191_vm2, %v262_v23 }
 0x189   :  { %v229_v25 = vpop.f32.mrf.mxu1 }
 0x18a   :  { %v230_v26 = vadd.f32 %v502_v63, %v229_v25 }
 0x18c   :  { %v253_v29 = vmax.f32 %v230_v26, 0.0 }
 0x191   :  { %v231_v27 = vpop.f32.mrf.mxu1 }
 0x192   :  { %v232_v28 = vadd.f32 %v502_v63, %v231_v27 }
 0x194   :  { %v254_v30 = vmax.f32 %v232_v28, 0.0  ;;  %v244_v24 = vpop.f32.mrf.mxu3 }
 0x195   :  { %v245_v32 = vadd.f32 %v502_v63, %v244_v24 }
 0x196   :  { %v263_v31 = vpack.c.bf16 %v254_v30, %v253_v29 }
 0x197   :  { %v259_v35 = vmax.f32 %v245_v32, 0.0 }
 0x198   :  { %453 = vmatmul.msk.bf16.gmra.mxu2 %vm191_vm2, %v263_v31 }
 0x199   :  { %v234_v33 = vpop.f32.mrf.mxu1 }
 0x19a   :  { %v235_v38 = vadd.f32 %v502_v63, %v234_v33 }
 0x19c   :  { %v246_v34 = vpop.f32.mrf.mxu3  ;;  %v255_v42 = vmax.f32 %v235_v38, 0.0 }
 0x19d   :  { %v247_v36 = vadd.f32 %v502_v63, %v246_v34 }
 0x19f   :  { %v260_v37 = vmax.f32 %v247_v36, 0.0 }
 0x1a1   :  { %v266_v39 = vpack.c.bf16 %v260_v37, %v259_v35  ;;  %v236_v40 = vpop.f32.mrf.mxu1 }
 0x1a2   :  { %v237_v41 = vadd.f32 %v502_v63, %v236_v40  ;;  %v504_v40 = vld [vmem:[%s700_s8] ss:$0 sm:$0xff] }
 0x1a3   :  { %456 = vmatmul.msk.bf16.vlgmr.msra.gmra.mxu3 %vm191_vm2, %v266_v39 }
 0x1a4   :  { %v256_v43 = vmax.f32 %v237_v41, 0.0 }
 0x1a6   :  { %v264_v44 = vpack.c.bf16 %v256_v43, %v255_v42 }
 0x1a7   :  { %v314_v52 = vpop.f32.mrf.mxu2 }
 0x1a8   :  { %454 = vmatmul.msk.bf16.gmra.mxu2 %vm191_vm2, %v264_v44 }
 0x1a9   :  { %v239_v45 = vpop.f32.mrf.mxu1 }
 0x1aa   :  { %v240_v46 = vadd.f32 %v502_v63, %v239_v45 }
 0x1ac   :  { %v257_v49 = vmax.f32 %v240_v46, 0.0 }
 0x1af   :  { %v316_v53 = vpop.f32.mrf.mxu2 }
 0x1b1   :  { %v241_v47 = vpop.f32.mrf.mxu1 }
 0x1b2   :  { %v242_v48 = vadd.f32 %v502_v63, %v241_v47  ;;  %v503_v63 = vld [vmem:[%s698_s6] ss:$0 sm:$0xff] }
 0x1b3   :  { %v315_v4 = vadd.f32 %v503_v63, %v314_v52  ;;  %v317_v5 = vadd.f32 %v503_v63, %v316_v53 }
 0x1b4   :  { %v258_v50 = vmax.f32 %v242_v48, 0.0 }
 0x1b5   :  { %v344_v14 = vmax.f32 %v315_v4, 0.0  ;;  %v345_v15 = vmax.f32 %v317_v5, 0.0 }
 0x1b6   :  { %v265_v51 = vpack.c.bf16 %v258_v50, %v257_v49 }
 0x1b7   :  { %v319_v54 = vpop.f32.mrf.mxu2 }
 0x1b8   :  { %455 = vmatmul.msk.bf16.gmra.mxu2 %vm191_vm2, %v265_v51  ;;  %v320_v6 = vadd.f32 %v503_v63, %v319_v54 }
 0x1ba   :  { %v346_v18 = vmax.f32 %v320_v6, 0.0 }
 0x1bf   :  { %v321_v55 = vpop.f32.mrf.mxu2 }
 0x1c0   :  { %v322_v9 = vadd.f32 %v503_v63, %v321_v55 }
 0x1c2   :  { %v347_v22 = vmax.f32 %v322_v9, 0.0 }
 0x21b   :  { %v324_v56 = vpop.f32.mrf.mxu2 }
 0x21c   :  { %v325_v1 = vadd.f32 %v503_v63, %v324_v56 }
 0x21e   :  { %v348_v10 = vmax.f32 %v325_v1, 0.0 }
 0x220   :  { %v356_v23 = vadd.f32 %v348_v10, %v344_v14 }
 0x223   :  { %v326_v57 = vpop.f32.mrf.mxu2 }
 0x224   :  { %v327_v2 = vadd.f32 %v503_v63, %v326_v57 }
 0x226   :  { %v339_v62 = vpop.f32.mrf.mxu3  ;;  %v349_v11 = vmax.f32 %v327_v2, 0.0 }
 0x227   :  { %v340_v12 = vadd.f32 %v503_v63, %v339_v62 }
 0x228   :  { %v357_v25 = vadd.f32 %v349_v11, %v345_v15 }
 0x229   :  { %v354_v26 = vmax.f32 %v340_v12, 0.0 }
 0x22b   :  { %v329_v58 = vpop.f32.mrf.mxu2 }
 0x22c   :  { %v330_v3 = vadd.f32 %v503_v63, %v329_v58 }
 0x22e   :  { %v350_v13 = vmax.f32 %v330_v3, 0.0  ;;  %v341_v16 = vpop.f32.mrf.mxu3 }
 0x22f   :  { %v342_v28 = vadd.f32 %v503_v63, %v341_v16 }
 0x230   :  { %v358_v27 = vadd.f32 %v350_v13, %v346_v18 }
 0x231   :  { %v355_v33 = vmax.f32 %v342_v28, 0.0 }
 0x232   :  { %v362_v32 = vadd.f32 %v358_v27, %v354_v26 }
 0x233   :  { %v331_v61 = vpop.f32.mrf.mxu2 }
 0x234   :  { %v332_v7 = vadd.f32 %v503_v63, %v331_v61 }
 0x236   :  { %v351_v19 = vmax.f32 %v332_v7, 0.0 }
 0x238   :  { %v359_v30 = vadd.f32 %v351_v19, %v347_v22 }
 0x23a   :  { %v363_v35 = vadd.f32 %v359_v30, %v355_v33 }
 0x23b   :  { %v334_v0 = vpop.f32.mrf.mxu2 }
 0x23c   :  { %v335_v8 = vadd.f32 %v503_v63, %v334_v0 }
 0x23e   :  { %v352_v20 = vmax.f32 %v335_v8, 0.0 }
 0x240   :  { %v360_v24 = vadd.f32 %v356_v23, %v352_v20 }
 0x243   :  { %v336_v17 = vpop.f32.mrf.mxu2 }
 0x244   :  { %v337_v21 = vadd.f32 %v503_v63, %v336_v17 }
 0x246   :  { %v353_v29 = vmax.f32 %v337_v21, 0.0 }
 0x248   :  { %v361_v31 = vadd.f32 %v357_v25, %v353_v29 }
 0x24a   :  { %v364_v34 = vadd.f32 %v361_v31, %v360_v24 }
 0x24c   :  { %v365_v36 = vadd.f32 %v364_v34, %v362_v32 }
 0x24e   :  { %v366_v37 = vadd.f32 %v365_v36, %v363_v35 }
 0x250   :  { %v367_v38 = vmul.f32 0.083333336, %v366_v37 }
 0x252   :  { %v368_v39 = vpack.c.bf16 %v367_v38, %v367_v38 }
 0x254   :  { %465 = vmatmul.msk.bf16.vlgmr.msrb.gmra.mxu3 %vm191_vm2, %v368_v39 }
 0x2d7   :  { %v401_v41 = vpop.f32.mrf.mxu3 }
 0x2d8   :  { %v402_v42 = vadd.f32 %v504_v40, %v401_v41 }
 0x2da   :  { %405 = vst [vmem:[#allocation5] sm:$0xff] %v402_v42 }
 0x2db   :  { %416 = dma.vmem_to_hbm [thread:$0]  %s412_s16, 128, %s414_s19, [#allocation4]  }
 0x2df   :  { %v403_v43 = vpop.f32.mrf.mxu3 }
 0x2e0   :  { %555 = dma.done.wait [#allocation4], 128  }
 0x2e1   :  { %556 = vsyncadd [#allocation4], 4294967168 }
 0x2e2   :  { %421 = vsyncpa [#allocation3], 1 }
 0x2e3   :  { %422 = vsyncpa [#allocation4], 1 }

// kernel: tpu_custom_call.1
= control target key start
LH: loop header
LB: loop body
LE: loop exit
PB: predicated region body
PF: predicated region fallthrough
CT: control target
= control target key end

     0   :  { %14 = vsyncpa [#allocation3], 0  ;;  %s692_s0 = inlined_call_operand.vmem [shape: f32[1,32,16], index: 0, kind: input, shape index: {}]   ;;  %s693_s1 = inlined_call_operand.hbm [shape: bf16[8,32], index: 1, kind: input, shape index: {}]   ;;  %s694_s2 = inlined_call_operand.vmem [shape: f32[1,32], index: 2, kind: input, shape index: {}]   ;;  %s695_s3 = inlined_call_operand.vmem [shape: bf16[32,32], index: 3, kind: input, shape index: {}]   ;;  %s696_s4 = inlined_call_operand.vmem [shape: f32[1,32], index: 4, kind: input, shape index: {}]   ;;  %s697_s5 = inlined_call_operand.vmem [shape: bf16[32,32], index: 5, kind: input, shape index: {}]   ;;  %s698_s6 = inlined_call_operand.vmem [shape: f32[1,32], index: 6, kind: input, shape index: {}]   ;;  %s699_s7 = inlined_call_operand.vmem [shape: bf16[32,128], index: 7, kind: input, shape index: {}]   ;;  %s700_s8 = inlined_call_operand.vmem [shape: f32[1,128], index: 8, kind: input, shape index: {}]   ;;  %s701_s9 = inlined_call_operand.hbm [shape: f32[8,128], index: 9, kind: output, shape index: {}]  }
   0x1   :  { %15 = vsyncpa [#allocation4], 0  ;;  %s23_s11 = sshll.u32 %s693_s1, 4  ;;  %s557_s12 = smov [#allocation2]   ;;  %s24_s11 = int_to_ptr.hbm [resolvable:$true] %s23_s11 }
   0x2   :  { %s25_s13 = sshll.u32 %s557_s12, 4  ;;  %s26_s13 = int_to_ptr.vmem [resolvable:$true] %s25_s13 }
   0x3   :  { %28 = dma.hbm_to_vmem [thread:$0]  %s24_s11, 64, %s26_s13, [#allocation3]  }
   0x4   :  { %553 = dma.done.wait [#allocation3], 64  }
   0x5   :  { %554 = vsyncadd [#allocation3], 4294967232  ;;  %vm110_vm0 = vcmask 1043456   ;;  %v50_v0 = vld [vmem:[%s692_s0 + $0x10] sm:$0xff]  ;;  %v51_v1 = vld [vmem:[%s692_s0 + $0x18] sm:$0xff]  ;;  %s558_s21 = smov 120  }
   0x6   :  { %v48_v2 = vld [vmem:[%s692_s0] sm:$0xff]  ;;  %v491_v3 = vpack.i.bf16 %v51_v1, %v50_v0  ;;  %v49_v4 = vld [vmem:[%s692_s0 + $0x8] sm:$0xff]  ;;  %vm91_vm1 = vcmask 64512   ;;  %s559_s22 = smov 124   ;;  %v81_v9 = vpack.c.bf16 %v51_v1, %v50_v0  ;;  %vm191_vm2 = vcmask 261120   ;;  %s560_s15 = smov [#allocation5]  }
   0x7   :  { %v86_v5 = vld [vmem:[#allocation2] sm:$0xf]  ;;  %v481_v6 = vpack.i.bf16 %v49_v4, %v48_v2  ;;  %v80_v8 = vpack.c.bf16 %v49_v4, %v48_v2  ;;  %v467_v18 = vld [vmem:[%s695_s3 + $0x8] sm:$0xff]  ;;  %s411_s16 = sshll.u32 %s560_s15, 4  ;;  %s413_s19 = sshll.u32 %s701_s9, 4  ;;  %s412_s16 = int_to_ptr.vmem [resolvable:$true] %s411_s16  ;;  %s414_s19 = int_to_ptr.hbm [resolvable:$true] %s413_s19 }
   0x8   :  { %v112_v7 = vsel %vm110_vm0, %v86_v5, 0  ;;  %492 = vrot.lane.b32.xlu1 %v491_v3, %s558_s21  ;;  %216 = vmatpush.bf16.msra.mxu1 %v467_v18  ;;  %v466_v19 = vld [vmem:[%s695_s3] sm:$0xff]  ;;  %v469_v55 = vld [vmem:[%s697_s5 + $0x8] sm:$0xff] }
   0x9   :  { %121 = vmatpush.bf16.msra.mxu0 %v112_v7  ;;  %482 = vrot.lane.b32.xlu0 %v481_v6, %s559_s22  ;;  %v639_v24 = vld [vmem:[%s694_s2] ss:$0 sm:$0xff] }
   0xa   :  { %472 = vmatpush.bf16.msra.mxu3 %v112_v7  ;;  %311 = vmatpush.bf16.msra.mxu2 %v469_v55  ;;  %v468_v58 = vld [vmem:[%s697_s5] sm:$0xff] }
   0xb   :  { %v502_v63 = vld [vmem:[%s696_s4] ss:$0 sm:$0xff] }
   0xc   :  { %423 = vmatmul.msk.bf16.vlgmr.msra.gmra.mxu0 %vm91_vm1, %v80_v8  ;;  %217 = vmatpush.bf16.msra.mxu1 %v466_v19 }
   0xe   :  { %473 = vmatpush.bf16.msrb.mxu3 %v467_v18  ;;  %312 = vmatpush.bf16.msra.mxu2 %v468_v58 }
  0x10   :  { %497 = vrot.lane.b32.xlu1 %v481_v6, %s558_s21 }
  0x11   :  { %487 = vrot.lane.b32.xlu0 %v491_v3, %s559_s22 }
  0x12   :  { %474 = vmatpush.bf16.msrb.mxu3 %v466_v19 }
  0x1c   :  { %424 = vmatmul.msk.bf16.gmra.mxu0 %vm91_vm1, %v81_v9 }
  0x7a   :  { %v493_v10 = vpop.permute.xlu1 %492 }
  0x7b   :  { %v495_v11 = vunpack.i.h.bf16 %v493_v10  ;;  %v494_v12 = vunpack.i.l.bf16 %v493_v10  ;;  %v483_v13 = vpop.permute.xlu0 %482 }
  0x7c   :  { %v485_v14 = vunpack.i.h.bf16 %v483_v13  ;;  %v484_v15 = vunpack.i.l.bf16 %v483_v13 }
  0x7d   :  { %v85_v16 = vpack.c.bf16 %v495_v11, %v494_v12 }
  0x7e   :  { %v82_v17 = vpack.c.bf16 %v485_v14, %v484_v15 }
  0x7f   :  { %428 = vmatmul.msk.bf16.vlgmr.msra.gmra.mxu3 %vm91_vm1, %v85_v16 }
  0x80   :  { %425 = vmatmul.msk.bf16.gmra.mxu0 %vm91_vm1, %v82_v17  ;;  %475 = vmatpush.bf16.msra.mxu3 %v469_v55 }
  0x82   :  { %v498_v31 = vpop.permute.xlu1 %497 }
  0x83   :  { %v488_v20 = vpop.permute.xlu0 %487  ;;  %v500_v33 = vunpack.i.h.bf16 %v498_v31  ;;  %v499_v34 = vunpack.i.l.bf16 %v498_v31 }
  0x84   :  { %v490_v21 = vunpack.i.h.bf16 %v488_v20  ;;  %v489_v22 = vunpack.i.l.bf16 %v488_v20  ;;  %476 = vmatpush.bf16.msra.mxu3 %v468_v58 }
  0x85   :  { %v84_v36 = vpack.c.bf16 %v500_v33, %v499_v34 }
  0x86   :  { %v83_v25 = vpack.c.bf16 %v490_v21, %v489_v22 }
  0x89   :  { %v123_v23 = vpop.f32.mrf.mxu0 }
  0x8a   :  { %v124_v26 = vadd.f32 %v639_v24, %v123_v23 }
  0x8c   :  { %v153_v28 = vmax.f32 %v124_v26, 0.0 }
  0x90   :  { %426 = vmatmul.msk.bf16.gmra.mxu0 %vm91_vm1, %v83_v25 }
  0x91   :  { %v125_v27 = vpop.f32.mrf.mxu0 }
  0x92   :  { %v126_v29 = vadd.f32 %v639_v24, %v125_v27 }
  0x94   :  { %v154_v30 = vmax.f32 %v126_v29, 0.0 }
  0x96   :  { %v165_v32 = vpack.c.bf16 %v154_v30, %v153_v28 }
  0x98   :  { %437 = vmatmul.msk.bf16.vlgmr.msra.gmra.mxu1 %vm191_vm2, %v165_v32 }
  0x99   :  { %v128_v35 = vpop.f32.mrf.mxu0 }
  0x9a   :  { %v129_v37 = vadd.f32 %v639_v24, %v128_v35 }
  0x9c   :  { %v155_v39 = vmax.f32 %v129_v37, 0.0 }
  0xa0   :  { %427 = vmatmul.msk.bf16.gmra.mxu0 %vm91_vm1, %v84_v36 }
  0xa1   :  { %v130_v38 = vpop.f32.mrf.mxu0 }
  0xa2   :  { %v131_v40 = vadd.f32 %v639_v24, %v130_v38 }
  0xa4   :  { %v156_v41 = vmax.f32 %v131_v40, 0.0 }
  0xa6   :  { %v166_v42 = vpack.c.bf16 %v156_v41, %v155_v39 }
  0xa8   :  { %438 = vmatmul.msk.bf16.gmra.mxu1 %vm191_vm2, %v166_v42 }
  0xfd   :  { %v133_v43 = vpop.f32.mrf.mxu0 }
  0xfe   :  { %v134_v45 = vadd.f32 %v639_v24, %v133_v43 }
 0x100   :  { %v157_v49 = vmax.f32 %v134_v45, 0.0 }
 0x102   :  { %v148_v44 = vpop.f32.mrf.mxu3 }
 0x103   :  { %v149_v48 = vadd.f32 %v639_v24, %v148_v44 }
 0x105   :  { %v135_v46 = vpop.f32.mrf.mxu0  ;;  %v163_v53 = vmax.f32 %v149_v48, 0.0 }
 0x106   :  { %v136_v47 = vadd.f32 %v639_v24, %v135_v46 }
 0x108   :  { %v158_v50 = vmax.f32 %v136_v47, 0.0 }
 0x10a   :  { %v167_v51 = vpack.c.bf16 %v158_v50, %v157_v49  ;;  %v150_v52 = vpop.f32.mrf.mxu3 }
 0x10b   :  { %v151_v54 = vadd.f32 %v639_v24, %v150_v52 }
 0x10c   :  { %439 = vmatmul.msk.bf16.gmra.mxu1 %vm191_vm2, %v167_v51 }
 0x10d   :  { %v164_v56 = vmax.f32 %v151_v54, 0.0  ;;  %v138_v57 = vpop.f32.mrf.mxu0 }
 0x10e   :  { %v139_v60 = vadd.f32 %v639_v24, %v138_v57 }
 0x10f   :  { %v170_v59 = vpack.c.bf16 %v164_v56, %v163_v53 }
 0x110   :  { %v159_v1 = vmax.f32 %v139_v60, 0.0  ;;  %v470_v60 = vld [vmem:[%s699_s7] sm:$0xff] }
 0x111   :  { %442 = vmatmul.msk.bf16.vlgmr.msrb.gmra.mxu3 %vm191_vm2, %v170_v59  ;;  %v471_v59 = vld [vmem:[%s699_s7 + $0x8] sm:$0xff] }
 0x112   :  { %398 = vmatpush.bf16.msrb.mxu3 %v471_v59 }
 0x115   :  { %v219_v61 = vpop.f32.mrf.mxu1  ;;  %v140_v62 = vpop.f32.mrf.mxu0 }
 0x116   :  { %v141_v0 = vadd.f32 %v639_v24, %v140_v62  ;;  %v220_v3 = vadd.f32 %v502_v63, %v219_v61  ;;  %399 = vmatpush.bf16.msrb.mxu3 %v470_v60 }
 0x118   :  { %v160_v2 = vmax.f32 %v141_v0, 0.0  ;;  %v249_v7 = vmax.f32 %v220_v3, 0.0 }
 0x11a   :  { %v168_v4 = vpack.c.bf16 %v160_v2, %v159_v1 }
 0x11c   :  { %440 = vmatmul.msk.bf16.gmra.mxu1 %vm191_vm2, %v168_v4 }
 0x11d   :  { %v221_v5 = vpop.f32.mrf.mxu1  ;;  %v143_v6 = vpop.f32.mrf.mxu0 }
 0x11e   :  { %v222_v8 = vadd.f32 %v502_v63, %v221_v5  ;;  %v144_v11 = vadd.f32 %v639_v24, %v143_v6 }
 0x120   :  { %v250_v9 = vmax.f32 %v222_v8, 0.0  ;;  %v161_v15 = vmax.f32 %v144_v11, 0.0 }
 0x122   :  { %v261_v10 = vpack.c.bf16 %v250_v9, %v249_v7 }
 0x124   :  { %451 = vmatmul.msk.bf16.vlgmr.msra.gmra.mxu2 %vm191_vm2, %v261_v10 }
 0x125   :  { %v224_v12 = vpop.f32.mrf.mxu1  ;;  %v145_v13 = vpop.f32.mrf.mxu0 }
 0x126   :  { %v146_v14 = vadd.f32 %v639_v24, %v145_v13  ;;  %v225_v17 = vadd.f32 %v502_v63, %v224_v12 }
 0x128   :  { %v162_v16 = vmax.f32 %v146_v14, 0.0  ;;  %v251_v20 = vmax.f32 %v225_v17, 0.0 }
 0x12a   :  { %v169_v18 = vpack.c.bf16 %v162_v16, %v161_v15 }
 0x12c   :  { %441 = vmatmul.msk.bf16.gmra.mxu1 %vm191_vm2, %v169_v18 }
 0x12d   :  { %v226_v19 = vpop.f32.mrf.mxu1 }
 0x12e   :  { %v227_v21 = vadd.f32 %v502_v63, %v226_v19 }
 0x130   :  { %v252_v22 = vmax.f32 %v227_v21, 0.0 }
 0x132   :  { %v262_v23 = vpack.c.bf16 %v252_v22, %v251_v20 }
 0x134   :  { %452 = vmatmul.msk.bf16.gmra.mxu2 %vm191_vm2, %v262_v23 }
 0x189   :  { %v229_v25 = vpop.f32.mrf.mxu1 }
 0x18a   :  { %v230_v26 = vadd.f32 %v502_v63, %v229_v25 }
 0x18c   :  { %v253_v29 = vmax.f32 %v230_v26, 0.0 }
 0x191   :  { %v231_v27 = vpop.f32.mrf.mxu1 }
 0x192   :  { %v232_v28 = vadd.f32 %v502_v63, %v231_v27 }
 0x194   :  { %v254_v30 = vmax.f32 %v232_v28, 0.0  ;;  %v244_v24 = vpop.f32.mrf.mxu3 }
 0x195   :  { %v245_v32 = vadd.f32 %v502_v63, %v244_v24 }
 0x196   :  { %v263_v31 = vpack.c.bf16 %v254_v30, %v253_v29 }
 0x197   :  { %v259_v35 = vmax.f32 %v245_v32, 0.0 }
 0x198   :  { %453 = vmatmul.msk.bf16.gmra.mxu2 %vm191_vm2, %v263_v31 }
 0x199   :  { %v234_v33 = vpop.f32.mrf.mxu1 }
 0x19a   :  { %v235_v38 = vadd.f32 %v502_v63, %v234_v33 }
 0x19c   :  { %v246_v34 = vpop.f32.mrf.mxu3  ;;  %v255_v42 = vmax.f32 %v235_v38, 0.0 }
 0x19d   :  { %v247_v36 = vadd.f32 %v502_v63, %v246_v34 }
 0x19f   :  { %v260_v37 = vmax.f32 %v247_v36, 0.0 }
 0x1a1   :  { %v266_v39 = vpack.c.bf16 %v260_v37, %v259_v35  ;;  %v236_v40 = vpop.f32.mrf.mxu1 }
 0x1a2   :  { %v237_v41 = vadd.f32 %v502_v63, %v236_v40  ;;  %v504_v40 = vld [vmem:[%s700_s8] ss:$0 sm:$0xff] }
 0x1a3   :  { %456 = vmatmul.msk.bf16.vlgmr.msra.gmra.mxu3 %vm191_vm2, %v266_v39 }
 0x1a4   :  { %v256_v43 = vmax.f32 %v237_v41, 0.0 }
 0x1a6   :  { %v264_v44 = vpack.c.bf16 %v256_v43, %v255_v42 }
 0x1a7   :  { %v314_v52 = vpop.f32.mrf.mxu2 }
 0x1a8   :  { %454 = vmatmul.msk.bf16.gmra.mxu2 %vm191_vm2, %v264_v44 }
 0x1a9   :  { %v239_v45 = vpop.f32.mrf.mxu1 }
 0x1aa   :  { %v240_v46 = vadd.f32 %v502_v63, %v239_v45 }
 0x1ac   :  { %v257_v49 = vmax.f32 %v240_v46, 0.0 }
 0x1af   :  { %v316_v53 = vpop.f32.mrf.mxu2 }
 0x1b1   :  { %v241_v47 = vpop.f32.mrf.mxu1 }
 0x1b2   :  { %v242_v48 = vadd.f32 %v502_v63, %v241_v47  ;;  %v503_v63 = vld [vmem:[%s698_s6] ss:$0 sm:$0xff] }
 0x1b3   :  { %v315_v4 = vadd.f32 %v503_v63, %v314_v52  ;;  %v317_v5 = vadd.f32 %v503_v63, %v316_v53 }
 0x1b4   :  { %v258_v50 = vmax.f32 %v242_v48, 0.0 }
 0x1b5   :  { %v344_v14 = vmax.f32 %v315_v4, 0.0  ;;  %v345_v15 = vmax.f32 %v317_v5, 0.0 }
 0x1b6   :  { %v265_v51 = vpack.c.bf16 %v258_v50, %v257_v49 }
 0x1b7   :  { %v319_v54 = vpop.f32.mrf.mxu2 }
 0x1b8   :  { %455 = vmatmul.msk.bf16.gmra.mxu2 %vm191_vm2, %v265_v51  ;;  %v320_v6 = vadd.f32 %v503_v63, %v319_v54 }
 0x1ba   :  { %v346_v18 = vmax.f32 %v320_v6, 0.0 }
 0x1bf   :  { %v321_v55 = vpop.f32.mrf.mxu2 }
 0x1c0   :  { %v322_v9 = vadd.f32 %v503_v63, %v321_v55 }
 0x1c2   :  { %v347_v22 = vmax.f32 %v322_v9, 0.0 }
 0x21b   :  { %v324_v56 = vpop.f32.mrf.mxu2 }
 0x21c   :  { %v325_v1 = vadd.f32 %v503_v63, %v324_v56 }
 0x21e   :  { %v348_v10 = vmax.f32 %v325_v1, 0.0 }
 0x220   :  { %v356_v23 = vadd.f32 %v348_v10, %v344_v14 }
 0x223   :  { %v326_v57 = vpop.f32.mrf.mxu2 }
 0x224   :  { %v327_v2 = vadd.f32 %v503_v63, %v326_v57 }
 0x226   :  { %v339_v62 = vpop.f32.mrf.mxu3  ;;  %v349_v11 = vmax.f32 %v327_v2, 0.0 }
 0x227   :  { %v340_v12 = vadd.f32 %v503_v63, %v339_v62 }
 0x228   :  { %v357_v25 = vadd.f32 %v349_v11, %v345_v15 }
 0x229   :  { %v354_v26 = vmax.f32 %v340_v12, 0.0 }
 0x22b   :  { %v329_v58 = vpop.f32.mrf.mxu2 }
 0x22c   :  { %v330_v3 = vadd.f32 %v503_v63, %v329_v58 }
 0x22e   :  { %v350_v13 = vmax.f32 %v330_v3, 0.0  ;;  %v341_v16 = vpop.f32.mrf.mxu3 }
 0x22f   :  { %v342_v28 = vadd.f32 %v503_v63, %v341_v16 }
 0x230   :  { %v358_v27 = vadd.f32 %v350_v13, %v346_v18 }
 0x231   :  { %v355_v33 = vmax.f32 %v342_v28, 0.0 }
 0x232   :  { %v362_v32 = vadd.f32 %v358_v27, %v354_v26 }
 0x233   :  { %v331_v61 = vpop.f32.mrf.mxu2 }
 0x234   :  { %v332_v7 = vadd.f32 %v503_v63, %v331_v61 }
 0x236   :  { %v351_v19 = vmax.f32 %v332_v7, 0.0 }
 0x238   :  { %v359_v30 = vadd.f32 %v351_v19, %v347_v22 }
 0x23a   :  { %v363_v35 = vadd.f32 %v359_v30, %v355_v33 }
 0x23b   :  { %v334_v0 = vpop.f32.mrf.mxu2 }
 0x23c   :  { %v335_v8 = vadd.f32 %v503_v63, %v334_v0 }
 0x23e   :  { %v352_v20 = vmax.f32 %v335_v8, 0.0 }
 0x240   :  { %v360_v24 = vadd.f32 %v356_v23, %v352_v20 }
 0x243   :  { %v336_v17 = vpop.f32.mrf.mxu2 }
 0x244   :  { %v337_v21 = vadd.f32 %v503_v63, %v336_v17 }
 0x246   :  { %v353_v29 = vmax.f32 %v337_v21, 0.0 }
 0x248   :  { %v361_v31 = vadd.f32 %v357_v25, %v353_v29 }
 0x24a   :  { %v364_v34 = vadd.f32 %v361_v31, %v360_v24 }
 0x24c   :  { %v365_v36 = vadd.f32 %v364_v34, %v362_v32 }
 0x24e   :  { %v366_v37 = vadd.f32 %v365_v36, %v363_v35 }
 0x250   :  { %v367_v38 = vmul.f32 0.083333336, %v366_v37 }
 0x252   :  { %v368_v39 = vpack.c.bf16 %v367_v38, %v367_v38 }
 0x254   :  { %465 = vmatmul.msk.bf16.vlgmr.msrb.gmra.mxu3 %vm191_vm2, %v368_v39 }
 0x2d7   :  { %v401_v41 = vpop.f32.mrf.mxu3 }
 0x2d8   :  { %v402_v42 = vadd.f32 %v504_v40, %v401_v41 }
 0x2da   :  { %405 = vst [vmem:[#allocation5] sm:$0xff] %v402_v42 }
 0x2db   :  { %416 = dma.vmem_to_hbm [thread:$0]  %s412_s16, 128, %s414_s19, [#allocation4]  }
 0x2df   :  { %v403_v43 = vpop.f32.mrf.mxu3 }
 0x2e0   :  { %555 = dma.done.wait [#allocation4], 128  }
 0x2e1   :  { %556 = vsyncadd [#allocation4], 4294967168 }
 0x2e2   :  { %421 = vsyncpa [#allocation3], 1 }
 0x2e3   :  { %422 = vsyncpa [#allocation4], 1 }

</bundles_post_ra>
